<compile_context>
chip_gen: v6e
topology: v6e:2x2x1
jax: 0.10.0
libtpu: 0.0.40
codegen_flags: <defaults>
</compile_context>

<pallas_src>
import jax
import jax.numpy as jnp
from jax.experimental import pallas as pl
from jax.experimental.pallas import tpu as pltpu

_HP = 128   # padded hidden width (lanes); must be >= hidden_size + 1 (bias unit)
_AP = 128   # padded action width (lanes); lane-dense output block


def _round_up(x, m):
    return (x + m - 1) // m * m


def _mlp_kernel(x_ref, w1_ref, w2_ref, o_ref):
    x = x_ref[...]        # (TB, K)   K = obs_size + 1 (ones column carries b1)
    w1 = w1_ref[...]      # (K, 128)  padded hidden; col `hidden` is the const-1 unit
    # Layer 1 on the VPU: K broadcast FMAs.  K is tiny, so an MXU pass would be
    # ~100% padding sitting behind the MXU result FIFO.
    h = x[:, 0:1] * w1[0:1, :]
    for k in range(1, x.shape[1]):                      # static, unrolled
        h = h + x[:, k:k + 1] * w1[k:k + 1, :]
    h = jnp.maximum(h, 0.0)                             # ReLU; const-1 unit stays 1
    # Layer 2 on the MXU: dense (TB,128)@(128,128), lane-dense full-width store.
    o_ref[...] = jnp.dot(h, w2_ref[...],
                         preferred_element_type=jnp.float32).astype(o_ref.dtype)


def fold_params(w1, b1, w2, b2):
    """Fold biases into zero-padded, lane-dense weight matrices (done once).

    w1: (obs, hidden), b1: (hidden,), w2: (hidden, n_actions), b2: (n_actions,)
    (weights kept in transposed (in, out) layout so y = x @ W + b matches
     PyTorch's nn.Linear y = x @ W.T + b).
    Returns (w1_aug (obs+1, 128), w2_aug (128, 128)).
    """
    obs, hidden = w1.shape
    n_actions = w2.shape[1]
    assert hidden + 1 <= _HP and n_actions <= _AP
    b1 = jnp.reshape(b1, (-1,)).astype(jnp.float32)
    b2 = jnp.reshape(b2, (-1,)).astype(jnp.float32)

    w1_aug = jnp.zeros((obs + 1, _HP), jnp.float32)
    w1_aug = w1_aug.at[:obs, :hidden].set(w1.astype(jnp.float32))
    w1_aug = w1_aug.at[obs, :hidden].set(b1)       # b1 fed by the ones column of x
    w1_aug = w1_aug.at[obs, hidden].set(1.0)       # constant-1 hidden unit (for b2)

    w2_aug = jnp.zeros((_HP, _AP), jnp.float32)
    w2_aug = w2_aug.at[:hidden, :n_actions].set(w2.astype(jnp.float32))
    w2_aug = w2_aug.at[hidden, :n_actions].set(b2)  # b2 via the constant-1 unit
    return w1_aug, w2_aug


def net_forward(x, w1_aug, w2_aug, n_actions, *, block_b=512):
    """Forward pass of Net. x: (B, obs) f32. Returns (B, n_actions) f32."""
    B, obs = x.shape
    K = obs + 1
    tb = min(block_b, _round_up(B, 8))       # batch tile (sublane-aligned)
    B_pad = _round_up(B, tb)                 # pad so the grid tiles evenly

    x_aug = jnp.concatenate(
        [x.astype(jnp.float32), jnp.ones((B, 1), jnp.float32)], axis=1)
    if B_pad != B:
        x_aug = jnp.pad(x_aug, ((0, B_pad - B), (0, 0)))

    out = pl.pallas_call(
        _mlp_kernel,
        out_shape=jax.ShapeDtypeStruct((B_pad, _AP), jnp.float32),
        grid=(B_pad // tb,),
        in_specs=[
            pl.BlockSpec((tb, K), lambda i: (i, 0)),      # streamed batch tile
            pl.BlockSpec((K, _HP), lambda i: (0, 0)),     # VMEM-resident weights
            pl.BlockSpec((_HP, _AP), lambda i: (0, 0)),   # VMEM-resident weights
        ],
        out_specs=pl.BlockSpec((tb, _AP), lambda i: (i, 0)),
        compiler_params=pltpu.CompilerParams(
            dimension_semantics=("parallel",),            # 2 TCs on v7x
        ),
    )(x_aug, w1_aug, w2_aug)
    return out[:B, :n_actions]


if __name__ == "__main__":
    # CartPole-like shapes: obs_size=4, hidden=32, n_actions=2.
    obs_size, hidden_size, n_actions = 4, 32, 2

    key = jax.random.PRNGKey(0)
    kx, k1, k2, k3, k4, kbig = jax.random.split(key, 6)
    # PyTorch stores W as (out, in); we keep the transposed (in, out) layout.
    w1 = jax.random.normal(k1, (obs_size, hidden_size), jnp.float32) * 0.1
    b1 = jax.random.normal(k2, (hidden_size,), jnp.float32) * 0.1
    w2 = jax.random.normal(k3, (hidden_size, n_actions), jnp.float32) * 0.1
    b2 = jax.random.normal(k4, (n_actions,), jnp.float32) * 0.1

    w1_aug, w2_aug = fold_params(w1, b1, w2, b2)   # one-time bias folding
    fwd = jax.jit(net_forward, static_argnames=("n_actions", "block_b"))

    def ref_fn(x):
        h = jnp.maximum(
            jnp.dot(x, w1, precision=jax.lax.Precision.HIGHEST) + b1, 0.0)
        return jnp.dot(h, w2, precision=jax.lax.Precision.HIGHEST) + b2

    # Small CartPole-scale batch (original use case).
    x_small = jax.random.normal(kx, (8, obs_size), jnp.float32)
    out_small = fwd(x_small, w1_aug, w2_aug, n_actions=n_actions)
    jax.block_until_ready(out_small)
    assert out_small.shape == (8, n_actions)
    assert jnp.allclose(out_small, ref_fn(x_small), atol=1e-5), "small-batch mismatch"

    # Large amortized batch (many env rollouts per call) exercising the grid.
    x_big = jax.random.normal(kbig, (4096, obs_size), jnp.float32)
    out_big = fwd(x_big, w1_aug, w2_aug, n_actions=n_actions)
    jax.block_until_ready(out_big)
    assert out_big.shape == (4096, n_actions)
    assert jnp.allclose(out_big, ref_fn(x_big), atol=1e-5), "large-batch mismatch"

    print("KERNEL_OK")
</pallas_src>

<mosaic_0001>
module attributes {stable_mosaic.version = 11 : i64} {
  func.func @_mlp_kernel(%arg0: i32, %arg1: memref<8x5xf32, #tpu.memory_space<vmem>>, %arg2: memref<5x128xf32, #tpu.memory_space<vmem>>, %arg3: memref<128x128xf32, #tpu.memory_space<vmem>>, %arg4: memref<8x128xf32, #tpu.memory_space<vmem>>) attributes {dimension_semantics = [#tpu.dimension_semantics<parallel>], iteration_bounds = array<i64: 1>, scalar_prefetch = 0 : i64, scratch_operands = 0 : i64, tpu.core_type = #tpu.core_type<tc>, window_params = [{transform_indices = @transform_0, window_bounds = array<i64: 8, 5>}, {pipeline_mode = #tpu.pipeline_mode<synchronous>, transform_indices = @transform_1, window_bounds = array<i64: 5, 128>}, {pipeline_mode = #tpu.pipeline_mode<synchronous>, transform_indices = @transform_2, window_bounds = array<i64: 128, 128>}, {transform_indices = @transform_3, window_bounds = array<i64: 8, 128>}]} {
    %c0 = arith.constant 0 : index
    %c0_0 = arith.constant 0 : index
    %0 = vector.load %arg1[%c0, %c0_0] : memref<8x5xf32, #tpu.memory_space<vmem>>, vector<8x5xf32>
    %c0_1 = arith.constant 0 : index
    %c0_2 = arith.constant 0 : index
    %1 = vector.load %arg2[%c0_1, %c0_2] : memref<5x128xf32, #tpu.memory_space<vmem>>, vector<5x128xf32>
    %2 = vector.extract_strided_slice %0 {offsets = [0, 0], sizes = [8, 1], strides = [1, 1]} : vector<8x5xf32> to vector<8x1xf32>
    %3 = vector.extract_strided_slice %1 {offsets = [0, 0], sizes = [1, 128], strides = [1, 1]} : vector<5x128xf32> to vector<1x128xf32>
    %4 = vector.broadcast %2 : vector<8x1xf32> to vector<8x128xf32>
    %5 = vector.broadcast %3 : vector<1x128xf32> to vector<8x128xf32>
    %6 = arith.mulf %4, %5 : vector<8x128xf32>
    %7 = vector.extract_strided_slice %0 {offsets = [0, 1], sizes = [8, 1], strides = [1, 1]} : vector<8x5xf32> to vector<8x1xf32>
    %8 = vector.extract_strided_slice %1 {offsets = [1, 0], sizes = [1, 128], strides = [1, 1]} : vector<5x128xf32> to vector<1x128xf32>
    %9 = vector.broadcast %7 : vector<8x1xf32> to vector<8x128xf32>
    %10 = vector.broadcast %8 : vector<1x128xf32> to vector<8x128xf32>
    %11 = arith.mulf %9, %10 : vector<8x128xf32>
    %12 = arith.addf %6, %11 : vector<8x128xf32>
    %13 = vector.extract_strided_slice %0 {offsets = [0, 2], sizes = [8, 1], strides = [1, 1]} : vector<8x5xf32> to vector<8x1xf32>
    %14 = vector.extract_strided_slice %1 {offsets = [2, 0], sizes = [1, 128], strides = [1, 1]} : vector<5x128xf32> to vector<1x128xf32>
    %15 = vector.broadcast %13 : vector<8x1xf32> to vector<8x128xf32>
    %16 = vector.broadcast %14 : vector<1x128xf32> to vector<8x128xf32>
    %17 = arith.mulf %15, %16 : vector<8x128xf32>
    %18 = arith.addf %12, %17 : vector<8x128xf32>
    %19 = vector.extract_strided_slice %0 {offsets = [0, 3], sizes = [8, 1], strides = [1, 1]} : vector<8x5xf32> to vector<8x1xf32>
    %20 = vector.extract_strided_slice %1 {offsets = [3, 0], sizes = [1, 128], strides = [1, 1]} : vector<5x128xf32> to vector<1x128xf32>
    %21 = vector.broadcast %19 : vector<8x1xf32> to vector<8x128xf32>
    %22 = vector.broadcast %20 : vector<1x128xf32> to vector<8x128xf32>
    %23 = arith.mulf %21, %22 : vector<8x128xf32>
    %24 = arith.addf %18, %23 : vector<8x128xf32>
    %25 = vector.extract_strided_slice %0 {offsets = [0, 4], sizes = [8, 1], strides = [1, 1]} : vector<8x5xf32> to vector<8x1xf32>
    %26 = vector.extract_strided_slice %1 {offsets = [4, 0], sizes = [1, 128], strides = [1, 1]} : vector<5x128xf32> to vector<1x128xf32>
    %27 = vector.broadcast %25 : vector<8x1xf32> to vector<8x128xf32>
    %28 = vector.broadcast %26 : vector<1x128xf32> to vector<8x128xf32>
    %29 = arith.mulf %27, %28 : vector<8x128xf32>
    %30 = arith.addf %24, %29 : vector<8x128xf32>
    %cst = arith.constant 0.000000e+00 : f32
    %31 = vector.broadcast %cst : f32 to vector<8x128xf32>
    %32 = arith.maximumf %30, %31 : vector<8x128xf32>
    %c0_3 = arith.constant 0 : index
    %c0_4 = arith.constant 0 : index
    %33 = vector.load %arg3[%c0_3, %c0_4] : memref<128x128xf32, #tpu.memory_space<vmem>>, vector<128x128xf32>
    %cst_5 = arith.constant dense<0.000000e+00> : vector<8x128xf32>
    %34 = tpu.matmul %32, %33, %cst_5 {dimension_numbers = #tpu.dot_dimension_numbers<[1], [0], [0], [1], [0, 0, 1, 1], [], []>} : vector<8x128xf32>, vector<128x128xf32>, vector<8x128xf32> -> vector<8x128xf32>
    %c0_6 = arith.constant 0 : index
    %c0_7 = arith.constant 0 : index
    %35 = vector.load %arg4[%c0_6, %c0_7] : memref<8x128xf32, #tpu.memory_space<vmem>>, vector<8x128xf32>
    tpu.vector_store %arg4[%c0_6, %c0_7], %34 {strides = array<i32>} : memref<8x128xf32, #tpu.memory_space<vmem>>, vector<8x128xf32>,
    return
  }
  func.func @transform_0(%arg0: i32) -> (i32, i32) {
    %c0_i32 = arith.constant 0 : i32
    %c0_i32_0 = arith.constant 0 : i32
    return %arg0, %c0_i32 : i32, i32
  }
  func.func @transform_1(%arg0: i32) -> (i32, i32) {
    %c0_i32 = arith.constant 0 : i32
    %c0_i32_0 = arith.constant 0 : i32
    %c0_i32_1 = arith.constant 0 : i32
    return %c0_i32, %c0_i32_0 : i32, i32
  }
  func.func @transform_2(%arg0: i32) -> (i32, i32) {
    %c0_i32 = arith.constant 0 : i32
    %c0_i32_0 = arith.constant 0 : i32
    %c0_i32_1 = arith.constant 0 : i32
    return %c0_i32, %c0_i32_0 : i32, i32
  }
  func.func @transform_3(%arg0: i32) -> (i32, i32) {
    %c0_i32 = arith.constant 0 : i32
    %c0_i32_0 = arith.constant 0 : i32
    return %arg0, %c0_i32 : i32, i32
  }
}

</mosaic_0001>

<bundles_post_ra>
// kernel: net_forward.1
= control target key start
LH: loop header
LB: loop body
LE: loop exit
PB: predicated region body
PF: predicated region fallthrough
CT: control target
= control target key end

     0   :  { %8 = vsyncpa [#allocation3], 0  ;;  %s263_s12 = smov [#allocation2]   ;;  %s305_s0 = inlined_call_operand.vmem [shape: f32[8,5], index: 0, kind: input, shape index: {}]   ;;  %s306_s1 = inlined_call_operand.vmem [shape: f32[5,128], index: 1, kind: input, shape index: {}]   ;;  %s307_s2 = inlined_call_operand.hbm [shape: f32[128,128], index: 2, kind: input, shape index: {}]   ;;  %s308_s3 = inlined_call_operand.vmem [shape: f32[8,128], index: 3, kind: output, shape index: {}]  }
   0x1   :  { %s18_s13 = sshll.u32 %s263_s12, 4  ;;  %s19_s13 = int_to_ptr.vmem [resolvable:$true] %s18_s13 }
   0x2   :  { %s249_s14 = scalar_lea.vmem %s19_s13, 2048  ;;  %p254_p1 = scmp.lt.s32.totalorder %s19_s13, %s19_s13 }
   0x3   :  { %p250_p0 = scmp.ne.s32.totalorder %s19_s13, %s249_s14  ;;  %p255_p2 = scmp.lt.s32.totalorder %s249_s14, %s249_s14 }
   0x5   :  { %p256_p3 = por %p255_p2, %p254_p1 }
   0x7   :  { %p257_p4 = pnand %p256_p3, %p250_p0 }
   0x9   :  { %260 = shalt.err (!%p257_p4)
}
   0xa   :  { %s264_s15 = smov 128   ;;  %s265_s16 = smov 8  }
   0xb   :  { %24 = dma.hbm_to_vmem [thread:$0]  %s307_s2, 2048, %s19_s13, [#allocation3], %s264_s15, %s264_s15, %s265_s16  }
   0xc   :  { %261 = dma.done.wait [#allocation3], 2048  }
   0xd   :  { %262 = vsyncadd [#allocation3], 4294965248  ;;  %v266_v0 = vmov 0   ;;  %v267_v1 = vmov 2   ;;  %v268_v2 = vmov 0.0   ;;  %v28_v3 = vld [vmem:[%s305_s0] sm:$0xff]  ;;  %v35_v23 = vlaneseq }
   0xe   :  { %235 = vset.pattern.permute.xlu0 %v266_v0  ;;  %237 = vset.pattern.permute.xlu1 %v267_v1  ;;  %v96_v4 = vld [vmem:[#allocation2 + $0x78] sm:$0xff]  ;;  %v95_v5 = vld [vmem:[#allocation2 + $0x70] sm:$0xff]  ;;  %v269_v6 = vmov 1   ;;  %v270_v7 = vmov 3   ;;  %v94_v8 = vld [vmem:[#allocation2 + $0x68] sm:$0xff]  ;;  %v271_v11 = vmov 4  }
   0xf   :  { %190 = vmatprep.subr.mxu0 %v268_v2  ;;  %32 = vperm.xlu0 %235, %v28_v3   ;;  %v93_v9 = vld [vmem:[#allocation2 + $0x60] sm:$0xff]  ;;  %v92_v10 = vld [vmem:[#allocation2 + $0x58] sm:$0xff]  ;;  %v91_v12 = vld [vmem:[#allocation2 + $0x50] sm:$0xff]  ;;  %vm272_vm0 = vmmov 0   ;;  %v36_v24 = vshrl.u32 %v35_v23, 7 }
  0x10   :  { %51 = vperm.xlu1 %237, %v28_v3   ;;  %191 = vmatpush3.msra.mxu0 %v96_v4  ;;  %v90_v13 = vld [vmem:[#allocation2 + $0x48] sm:$0xff]  ;;  %v89_v14 = vld [vmem:[#allocation2 + $0x40] sm:$0xff]  ;;  %v88_v15 = vld [vmem:[#allocation2 + $0x38] sm:$0xff] }
  0x11   :  { %192 = vmatprep.subr.mxu0 %v268_v2  ;;  %222 = vmatprep.mubr.msk.f32.mxu0 %vm272_vm0, %v268_v2  ;;  %v87_v16 = vld [vmem:[#allocation2 + $0x30] sm:$0xff]  ;;  %v86_v17 = vld [vmem:[#allocation2 + $0x28] sm:$0xff]  ;;  %v85_v18 = vld [vmem:[#allocation2 + $0x20] sm:$0xff]  ;;  %v37_v25 = vsub.s32 0, %v36_v24  ;;  %v46_v26 = vsub.s32 1, %v36_v24  ;;  %v56_v29 = vsub.s32 2, %v36_v24 }
  0x12   :  { %193 = vmatpush3.msra.mxu0 %v95_v5  ;;  %v84_v19 = vld [vmem:[#allocation2 + $0x18] sm:$0xff]  ;;  %v83_v20 = vld [vmem:[#allocation2 + $0x10] sm:$0xff]  ;;  %v82_v21 = vld [vmem:[#allocation2 + $0x8] sm:$0xff]  ;;  %v66_v33 = vsub.s32 3, %v36_v24  ;;  %v76_v34 = vsub.s32 4, %v36_v24 }
  0x13   :  { %236 = vset.pattern.permute.xlu0 %v269_v6  ;;  %194 = vmatprep.subr.mxu0 %v268_v2  ;;  %v81_v22 = vld [vmem:[#allocation2] sm:$0xff] }
  0x14   :  { %238 = vset.pattern.permute.xlu1 %v270_v7  ;;  %41 = vperm.xlu0 %236, %v28_v3   ;;  %v29_v27 = vld [vmem:[%s306_s1] sm:$0x1f] }
  0x15   :  { %61 = vperm.xlu1 %238, %v28_v3   ;;  %195 = vmatpush3.msra.mxu0 %v94_v8  ;;  %v38_v31 = vrot.slane %v29_v27, %v37_v25  ;;  %v47_v32 = vrot.slane %v29_v27, %v46_v26  ;;  %v57_v35 = vrot.slane %v29_v27, %v56_v29 }
  0x16   :  { %196 = vmatprep.subr.mxu0 %v268_v2  ;;  %v67_v40 = vrot.slane %v29_v27, %v66_v33  ;;  %v77_v41 = vrot.slane %v29_v27, %v76_v34 }
  0x17   :  { %197 = vmatpush3.msra.mxu0 %v93_v9 }
  0x18   :  { %198 = vmatprep.subr.mxu0 %v268_v2  ;;  %240 = vset.pattern.permute.xlu0 %v271_v11 }
  0x19   :  { %239 = vset.pattern.permute.xlu1 %v271_v11  ;;  %199 = vmatpush3.msra.mxu0 %v92_v10 }
  0x1a   :  { %71 = vperm.xlu1 %239, %v28_v3   ;;  %200 = vmatprep.subr.mxu0 %v268_v2 }
  0x1b   :  { %201 = vmatpush3.msra.mxu0 %v91_v12 }
  0x1c   :  { %202 = vmatprep.subr.mxu0 %v268_v2 }
  0x1d   :  { %203 = vmatpush3.msra.mxu0 %v90_v13 }
  0x1e   :  { %204 = vmatprep.subr.mxu0 %v268_v2 }
  0x1f   :  { %205 = vmatpush3.msra.mxu0 %v89_v14 }
  0x20   :  { %206 = vmatprep.subr.mxu0 %v268_v2 }
  0x21   :  { %207 = vmatpush3.msra.mxu0 %v88_v15 }
  0x22   :  { %208 = vmatprep.subr.mxu0 %v268_v2 }
  0x23   :  { %209 = vmatpush3.msra.mxu0 %v87_v16 }
  0x24   :  { %210 = vmatprep.subr.mxu0 %v268_v2 }
  0x25   :  { %211 = vmatpush3.msra.mxu0 %v86_v17 }
  0x26   :  { %212 = vmatprep.subr.mxu0 %v268_v2 }
  0x27   :  { %213 = vmatpush3.msra.mxu0 %v85_v18 }
  0x28   :  { %214 = vmatprep.subr.mxu0 %v268_v2 }
  0x29   :  { %215 = vmatpush3.msra.mxu0 %v84_v19 }
  0x2a   :  { %216 = vmatprep.subr.mxu0 %v268_v2 }
  0x2b   :  { %217 = vmatpush3.msra.mxu0 %v83_v20 }
  0x2c   :  { %218 = vmatprep.subr.mxu0 %v268_v2 }
  0x2d   :  { %219 = vmatpush3.msra.mxu0 %v82_v21 }
  0x2e   :  { %220 = vmatprep.subr.mxu0 %v268_v2 }
  0x2f   :  { %221 = vmatpush3.msra.mxu0 %v81_v22 }
  0x8a   :  { %v33_v28 = vpop.permute.xlu0 %32 }
  0x8b   :  { %v52_v30 = vpop.permute.xlu1 %51  ;;  %v39_v38 = vmul.f32 %v38_v31, %v33_v28 }
  0x8c   :  { %v58_v42 = vmul.f32 %v57_v35, %v52_v30 }
  0x8f   :  { %v42_v36 = vpop.permute.xlu0 %41 }
  0x90   :  { %v62_v37 = vpop.permute.xlu1 %61  ;;  %v48_v39 = vmul.f32 %v47_v32, %v42_v36 }
  0x91   :  { %v68_v45 = vmul.f32 %v67_v40, %v62_v37 }
  0x92   :  { %v49_v43 = vadd.f32 %v48_v39, %v39_v38 }
  0x94   :  { %v59_v44 = vadd.f32 %v58_v42, %v49_v43 }
  0x95   :  { %v72_v46 = vpop.permute.xlu1 %71 }
  0x96   :  { %v78_v47 = vmul.f32 %v77_v41, %v72_v46  ;;  %v69_v48 = vadd.f32 %v68_v45, %v59_v44 }
  0x98   :  { %v79_v49 = vadd.f32 %v78_v47, %v69_v48 }
  0x9a   :  { %v80_v50 = vmax.f32 %v79_v49, 0.0 }
  0x9c   :  { %223 = vmatmul.mubr.f32.vlgmr.msra.gmra.mxu0 %v80_v50 }
 0x15c   :  { %v163_v51 = vpop.f32.mrf.mxu0 }
 0x15d   :  { %167 = vst [vmem:[%s308_s3] sm:$0xff] %v163_v51 }
 0x15e   :  { %v224_v52 = vpop.f32.mrf.mxu0 }
 0x15f   :  { %172 = vsyncpa [#allocation3], 1 }

</bundles_post_ra>
